<compile_context>
chip_gen: v5e
topology: v5e:2x2
jax: 0.10.0
libtpu: 0.0.40
codegen_flags: <defaults>
</compile_context>

<pallas_src>
import functools

import jax
import jax.numpy as jnp
from jax.experimental import pallas as pl
from jax.experimental.pallas import tpu as pltpu
from jax.scipy.linalg import block_diag

MIXER_WIDTH = 32   # fixed by the module: nn.Linear(state_dim + 1, 32)
LANE = 128


def _cdiv(a, b):
    return (a + b - 1) // b


def _round_up(n, m):
    return ((n + m - 1) // m) * m


# -----------------------------------------------------------------------------
# Kernel (feature-major: arrays are (features, batch); batch maps to lanes)
# -----------------------------------------------------------------------------
def msode_kernel(
    inp_ref,                                    # (D+3, TB)  rows: x, t, sin t, cos t
    w1_ref, b1_ref,                             # (2H+M, D+3), (2H+M, 1)
    mh_ref, mhb_ref,                            # (1, 2H+M),  (1, 1)
    w2_ref, b2_ref, w3_ref, b3_ref,             # (2H, 2H),   (2H, 1)
    w4_ref, b4_ref,                             # (2D, 2H),   (2D, 1)
    out_ref,                                    # (D, TB)
    *, hidden_dim, state_dim,
):
    H, D = hidden_dim, state_dim
    inp = inp_ref[...].astype(jnp.float32)

    def mm(w_ref, a):
        return jnp.dot(w_ref[...], a, preferred_element_type=jnp.float32)

    def act(z):
        # rows [0:H] -> tanh (fast trunk); rows [H:] -> relu (slow trunk / mixer)
        r = jax.lax.broadcasted_iota(jnp.int32, z.shape, 0)
        return jnp.where(r < H, jnp.tanh(z), jnp.maximum(z, 0.0))

    # Layer 1: fused fast | slow | mixer-hidden, single K = D+3 matmul.
    h1 = act(mm(w1_ref, inp) + b1_ref[...])            # (2H+M, TB)

    # Mixer: softmax over 2 logits == sigmoid(logit0 - logit1); lane-dense row.
    d = mm(mh_ref, h1) + mhb_ref[...]                  # (1, TB)
    w0 = 0.5 * jnp.tanh(0.5 * d) + 0.5                 # == softmax[:, 0]

    # Trunk layers operate on rows [0:2H] of h1 (sublane-aligned slice).
    h = h1[:2 * H, :]
    h = act(mm(w2_ref, h) + b2_ref[...])
    h = act(mm(w3_ref, h) + b3_ref[...])
    dx = mm(w4_ref, h) + b4_ref[...]                   # (2D, TB)
    fast_dx = dx[:D, :]
    slow_dx = dx[D:, :]

    # out = w0*fast + (1 - w0)*slow
    out_ref[...] = (slow_dx + w0 * (fast_dx - slow_dx)).astype(out_ref.dtype)


# -----------------------------------------------------------------------------
# Wrapper
# -----------------------------------------------------------------------------
@jax.jit
def multi_scale_neural_ode_forward(t, x, fused):
    """fused: tuple produced by fuse_params() (feature-major / transposed)."""
    (w1T, b1T, mhT, mhb, w2T, b2T, w3T, b3T, w4T, b4T) = fused
    B, D = x.shape
    H = (w1T.shape[0] - MIXER_WIDTH) // 2

    # mimic torch: scalar t -> broadcast to batch, then unsqueeze(-1)
    if t.ndim == 0:
        t = jnp.broadcast_to(t, (B,))
    if t.ndim == 1:
        t = t[:, None]
    t = t.astype(jnp.float32)
    x = x.astype(jnp.float32)

    # Time features + concat done once here (plain XLA); feature-major slab.
    inpT = jnp.concatenate([x, t, jnp.sin(t), jnp.cos(t)], axis=-1).T  # (D+3, B)

    # Batch tiling: large lane-aligned tiles that divide the padded batch.
    # Keep >= 2 tiles when B is large enough so the "parallel" grid axis can
    # use both v7x TensorCores (extra step is noise on v5e/v6e, 1 TC/chip).
    TB_MAX = 4096
    n_tiles = _cdiv(B, TB_MAX)
    if B >= 2 * LANE:
        n_tiles = max(n_tiles, 2)
    TB = _round_up(_cdiv(B, n_tiles), LANE)
    grid_n = _cdiv(B, TB)
    Bp = grid_n * TB
    if Bp != B:
        inpT = jnp.pad(inpT, ((0, 0), (0, Bp - B)))

    def batch_spec(rows):
        return pl.BlockSpec((rows, TB), lambda i: (0, i))

    def resident_spec(a):
        return pl.BlockSpec(a.shape, lambda i: (0, 0))

    kernel = functools.partial(msode_kernel, hidden_dim=H, state_dim=D)
    outT = pl.pallas_call(
        kernel,
        out_shape=jax.ShapeDtypeStruct((D, Bp), jnp.float32),
        grid=(grid_n,),
        in_specs=[batch_spec(D + 3)] + [resident_spec(a) for a in fused],
        out_specs=batch_spec(D),
        compiler_params=pltpu.CompilerParams(
            dimension_semantics=("parallel",)),
    )(inpT, *fused)
    return outT[:, :B].T


# -----------------------------------------------------------------------------
# Parameter construction (PyTorch nn.Linear-style uniform init) + fusion
# -----------------------------------------------------------------------------
def init_linear(key, fan_in, fan_out, w_scale=1.0):
    # torch scales only the last layer's *weight* (net[-1].weight.data *= s);
    # bias is left unscaled, matched here.
    kw, kb = jax.random.split(key)
    bound = 1.0 / jnp.sqrt(jnp.float32(fan_in))
    w = jax.random.uniform(kw, (fan_in, fan_out), jnp.float32, -bound, bound) * w_scale
    b = jax.random.uniform(kb, (1, fan_out), jnp.float32, -bound, bound)
    return w, b


def build_params(key, state_dim, hidden_dim):
    keys = jax.random.split(key, 10)
    in_dim = state_dim + 3
    fw1, fb1 = init_linear(keys[0], in_dim, hidden_dim)
    fw2, fb2 = init_linear(keys[1], hidden_dim, hidden_dim)
    fw3, fb3 = init_linear(keys[2], hidden_dim, hidden_dim)
    fw4, fb4 = init_linear(keys[3], hidden_dim, state_dim, w_scale=10.0)
    sw1, sb1 = init_linear(keys[4], in_dim, hidden_dim)
    sw2, sb2 = init_linear(keys[5], hidden_dim, hidden_dim)
    sw3, sb3 = init_linear(keys[6], hidden_dim, hidden_dim)
    sw4, sb4 = init_linear(keys[7], hidden_dim, state_dim, w_scale=0.1)
    mw1, mb1 = init_linear(keys[8], state_dim + 1, MIXER_WIDTH)
    mw2, mb2 = init_linear(keys[9], MIXER_WIDTH, 2)
    return (fw1, fb1, fw2, fb2, fw3, fb3, fw4, fb4,
            sw1, sb1, sw2, sb2, sw3, sb3, sw4, sb4,
            mw1, mb1, mw2, mb2)


def fuse_params(params, state_dim, hidden_dim):
    """Build fused, feature-major (transposed) kernel weights."""
    (fw1, fb1, fw2, fb2, fw3, fb3, fw4, fb4,
     sw1, sb1, sw2, sb2, sw3, sb3, sw4, sb4,
     mw1, mb1, mw2, mb2) = params
    D, H = state_dim, hidden_dim
    # Layer 1: [fast | slow | mixer-hidden].  Mixer sees [x, t] only, so its
    # rows for sin(t)/cos(t) are zero.  Feature rows: x(D), t, sin t, cos t.
    mw1_exp = jnp.concatenate(
        [mw1[:D], mw1[D:D + 1], jnp.zeros((2, MIXER_WIDTH), mw1.dtype)], axis=0)
    w1 = jnp.concatenate([fw1, sw1, mw1_exp], axis=1)        # (D+3, 2H+M)
    b1 = jnp.concatenate([fb1, sb1, mb1], axis=1)            # (1, 2H+M)
    # Trunk layers: block-diagonal keeps fast/slow independent.
    w2 = block_diag(fw2, sw2); b2 = jnp.concatenate([fb2, sb2], axis=1)
    w3 = block_diag(fw3, sw3); b3 = jnp.concatenate([fb3, sb3], axis=1)
    w4 = block_diag(fw4, sw4); b4 = jnp.concatenate([fb4, sb4], axis=1)
    # Mixer head: 2-way softmax -> sigmoid(logit0 - logit1); zero-padded over
    # the trunk rows so it applies directly to the layer-1 activation.
    mdw = mw2[:, 0:1] - mw2[:, 1:2]                          # (M, 1)
    mh = jnp.concatenate([jnp.zeros((2 * H, 1), mdw.dtype), mdw], axis=0)
    mhb = mb2[:, 0:1] - mb2[:, 1:2]                          # (1, 1)
    # Feature-major (transposed) layout: lanes = batch in the kernel.
    return (w1.T, b1.T, mh.T, mhb,
            w2.T, b2.T, w3.T, b3.T, w4.T, b4.T)


# -----------------------------------------------------------------------------
# Pure-JAX reference (unfused, mirrors the PyTorch forward) for self-check
# -----------------------------------------------------------------------------
def reference_forward(t, x, params):
    (fw1, fb1, fw2, fb2, fw3, fb3, fw4, fb4,
     sw1, sb1, sw2, sb2, sw3, sb3, sw4, sb4,
     mw1, mb1, mw2, mb2) = params
    B = x.shape[0]
    if t.ndim == 0:
        t = jnp.broadcast_to(t, (B,))
    if t.ndim == 1:
        t = t[:, None]
    inp = jnp.concatenate([x, t, jnp.sin(t), jnp.cos(t)], axis=-1)
    h = jnp.tanh(inp @ fw1 + fb1)
    h = jnp.tanh(h @ fw2 + fb2)
    h = jnp.tanh(h @ fw3 + fb3)
    fast_dx = h @ fw4 + fb4
    g = jnp.maximum(inp @ sw1 + sb1, 0.0)
    g = jnp.maximum(g @ sw2 + sb2, 0.0)
    g = jnp.maximum(g @ sw3 + sb3, 0.0)
    slow_dx = g @ sw4 + sb4
    mix_in = jnp.concatenate([x, t], axis=-1)
    m = jnp.maximum(mix_in @ mw1 + mb1, 0.0)
    w = jax.nn.softmax(m @ mw2 + mb2, axis=-1)
    return w[:, 0:1] * fast_dx + w[:, 1:2] * slow_dx


# TODO(synk): `integrate` (odeint / adjoint solver) is a host-level time loop,
# not a single-kernel op; for real solver runs, move the time loop inside the
# kernel (grid axis over steps, weights VMEM-resident once, state carried via
# input_output_aliases) to amortize launch + weight DMA — budget resident
# buffers against v7x's 64 MiB VMEM.

if __name__ == "__main__":
    STATE_DIM = 4
    HIDDEN_DIM = 32

    key = jax.random.PRNGKey(0)
    k_params, k_x1, k_x2, k_t = jax.random.split(key, 4)

    params = build_params(k_params, STATE_DIM, HIDDEN_DIM)
    fused = fuse_params(params, STATE_DIM, HIDDEN_DIM)

    # Case 1: small batch, scalar time (torch broadcast path), single tile.
    x1 = jax.random.normal(k_x1, (8, STATE_DIM), jnp.float32)
    t1 = jnp.float32(0.37)
    out1 = jax.block_until_ready(multi_scale_neural_ode_forward(t1, x1, fused))
    ref1 = reference_forward(t1, x1, params)
    assert out1.shape == (8, STATE_DIM)
    err1 = jnp.max(jnp.abs(out1 - ref1))
    assert jnp.allclose(out1, ref1, rtol=1e-4, atol=1e-4), (
        f"mismatch case1: max abs err = {err1}")

    # Case 2: larger batch with per-sample times -> multi-tile (parallel) grid.
    x2 = jax.random.normal(k_x2, (300, STATE_DIM), jnp.float32)
    t2 = jax.random.uniform(k_t, (300,), jnp.float32)
    out2 = jax.block_until_ready(multi_scale_neural_ode_forward(t2, x2, fused))
    ref2 = reference_forward(t2, x2, params)
    assert out2.shape == (300, STATE_DIM)
    err2 = jnp.max(jnp.abs(out2 - ref2))
    assert jnp.allclose(out2, ref2, rtol=1e-4, atol=1e-4), (
        f"mismatch case2: max abs err = {err2}")

    print("KERNEL_OK")
</pallas_src>

<mosaic_0001>
module attributes {stable_mosaic.version = 11 : i64} {
  func.func @msode_kernel(%arg0: i32, %arg1: memref<7x128xf32, #tpu.memory_space<vmem>>, %arg2: memref<96x7xf32, #tpu.memory_space<vmem>>, %arg3: memref<96x1xf32, #tpu.memory_space<vmem>>, %arg4: memref<1x96xf32, #tpu.memory_space<vmem>>, %arg5: memref<1x1xf32, #tpu.memory_space<vmem>>, %arg6: memref<64x64xf32, #tpu.memory_space<vmem>>, %arg7: memref<64x1xf32, #tpu.memory_space<vmem>>, %arg8: memref<64x64xf32, #tpu.memory_space<vmem>>, %arg9: memref<64x1xf32, #tpu.memory_space<vmem>>, %arg10: memref<8x64xf32, #tpu.memory_space<vmem>>, %arg11: memref<8x1xf32, #tpu.memory_space<vmem>>, %arg12: memref<4x128xf32, #tpu.memory_space<vmem>>) attributes {dimension_semantics = [#tpu.dimension_semantics<parallel>], iteration_bounds = array<i64: 1>, scalar_prefetch = 0 : i64, scratch_operands = 0 : i64, tpu.core_type = #tpu.core_type<tc>, window_params = [{transform_indices = @transform_0, window_bounds = array<i64: 7, 128>}, {pipeline_mode = #tpu.pipeline_mode<synchronous>, transform_indices = @transform_1, window_bounds = array<i64: 96, 7>}, {pipeline_mode = #tpu.pipeline_mode<synchronous>, transform_indices = @transform_2, window_bounds = array<i64: 96, 1>}, {pipeline_mode = #tpu.pipeline_mode<synchronous>, transform_indices = @transform_3, window_bounds = array<i64: 1, 96>}, {pipeline_mode = #tpu.pipeline_mode<synchronous>, transform_indices = @transform_4, window_bounds = array<i64: 1, 1>}, {pipeline_mode = #tpu.pipeline_mode<synchronous>, transform_indices = @transform_5, window_bounds = array<i64: 64, 64>}, {pipeline_mode = #tpu.pipeline_mode<synchronous>, transform_indices = @transform_6, window_bounds = array<i64: 64, 1>}, {pipeline_mode = #tpu.pipeline_mode<synchronous>, transform_indices = @transform_7, window_bounds = array<i64: 64, 64>}, {pipeline_mode = #tpu.pipeline_mode<synchronous>, transform_indices = @transform_8, window_bounds = array<i64: 64, 1>}, {pipeline_mode = #tpu.pipeline_mode<synchronous>, transform_indices = @transform_9, window_bounds = array<i64: 8, 64>}, {pipeline_mode = #tpu.pipeline_mode<synchronous>, transform_indices = @transform_10, window_bounds = array<i64: 8, 1>}, {transform_indices = @transform_11, window_bounds = array<i64: 4, 128>}]} {
    %c0 = arith.constant 0 : index
    %c0_0 = arith.constant 0 : index
    %0 = vector.load %arg1[%c0, %c0_0] : memref<7x128xf32, #tpu.memory_space<vmem>>, vector<7x128xf32>
    %c0_1 = arith.constant 0 : index
    %c0_2 = arith.constant 0 : index
    %1 = vector.load %arg2[%c0_1, %c0_2] : memref<96x7xf32, #tpu.memory_space<vmem>>, vector<96x7xf32>
    %cst = arith.constant dense<0.000000e+00> : vector<96x128xf32>
    %2 = tpu.matmul %1, %0, %cst {dimension_numbers = #tpu.dot_dimension_numbers<[1], [0], [0], [1], [0, 0, 1, 1], [], []>} : vector<96x7xf32>, vector<7x128xf32>, vector<96x128xf32> -> vector<96x128xf32>
    %c0_3 = arith.constant 0 : index
    %c0_4 = arith.constant 0 : index
    %3 = vector.load %arg3[%c0_3, %c0_4] : memref<96x1xf32, #tpu.memory_space<vmem>>, vector<96x1xf32>
    %4 = vector.broadcast %3 : vector<96x1xf32> to vector<96x128xf32>
    %5 = arith.addf %2, %4 : vector<96x128xf32>
    %6 = tpu.iota {dimensions = array<i32: 0>} : vector<96x128xi32>
    %c32_i32 = arith.constant 32 : i32
    %7 = vector.broadcast %c32_i32 : i32 to vector<96x128xi32>
    %8 = arith.cmpi slt, %6, %7 : vector<96x128xi32>
    %9 = math.tanh %5 : vector<96x128xf32>
    %cst_5 = arith.constant 0.000000e+00 : f32
    %10 = vector.broadcast %cst_5 : f32 to vector<96x128xf32>
    %11 = arith.maximumf %5, %10 : vector<96x128xf32>
    %12 = arith.select %8, %9, %11 : vector<96x128xi1>, vector<96x128xf32>
    %c0_6 = arith.constant 0 : index
    %c0_7 = arith.constant 0 : index
    %13 = vector.load %arg4[%c0_6, %c0_7] : memref<1x96xf32, #tpu.memory_space<vmem>>, vector<1x96xf32>
    %cst_8 = arith.constant dense<0.000000e+00> : vector<1x128xf32>
    %14 = tpu.matmul %13, %12, %cst_8 {dimension_numbers = #tpu.dot_dimension_numbers<[1], [0], [0], [1], [0, 0, 1, 1], [], []>} : vector<1x96xf32>, vector<96x128xf32>, vector<1x128xf32> -> vector<1x128xf32>
    %c0_9 = arith.constant 0 : index
    %c0_10 = arith.constant 0 : index
    %15 = vector.load %arg5[%c0_9, %c0_10] : memref<1x1xf32, #tpu.memory_space<vmem>>, vector<1x1xf32>
    %16 = vector.broadcast %15 : vector<1x1xf32> to vector<1x128xf32>
    %17 = arith.addf %14, %16 : vector<1x128xf32>
    %cst_11 = arith.constant 5.000000e-01 : f32
    %18 = vector.broadcast %cst_11 : f32 to vector<1x128xf32>
    %19 = arith.mulf %18, %17 : vector<1x128xf32>
    %20 = math.tanh %19 : vector<1x128xf32>
    %cst_12 = arith.constant 5.000000e-01 : f32
    %21 = vector.broadcast %cst_12 : f32 to vector<1x128xf32>
    %22 = arith.mulf %21, %20 : vector<1x128xf32>
    %cst_13 = arith.constant 5.000000e-01 : f32
    %23 = vector.broadcast %cst_13 : f32 to vector<1x128xf32>
    %24 = arith.addf %22, %23 : vector<1x128xf32>
    %25 = vector.extract_strided_slice %12 {offsets = [0, 0], sizes = [64, 128], strides = [1, 1]} : vector<96x128xf32> to vector<64x128xf32>
    %c0_14 = arith.constant 0 : index
    %c0_15 = arith.constant 0 : index
    %26 = vector.load %arg6[%c0_14, %c0_15] : memref<64x64xf32, #tpu.memory_space<vmem>>, vector<64x64xf32>
    %cst_16 = arith.constant dense<0.000000e+00> : vector<64x128xf32>
    %27 = tpu.matmul %26, %25, %cst_16 {dimension_numbers = #tpu.dot_dimension_numbers<[1], [0], [0], [1], [0, 0, 1, 1], [], []>} : vector<64x64xf32>, vector<64x128xf32>, vector<64x128xf32> -> vector<64x128xf32>
    %c0_17 = arith.constant 0 : index
    %c0_18 = arith.constant 0 : index
    %28 = vector.load %arg7[%c0_17, %c0_18] : memref<64x1xf32, #tpu.memory_space<vmem>>, vector<64x1xf32>
    %29 = vector.broadcast %28 : vector<64x1xf32> to vector<64x128xf32>
    %30 = arith.addf %27, %29 : vector<64x128xf32>
    %31 = tpu.iota {dimensions = array<i32: 0>} : vector<64x128xi32>
    %c32_i32_19 = arith.constant 32 : i32
    %32 = vector.broadcast %c32_i32_19 : i32 to vector<64x128xi32>
    %33 = arith.cmpi slt, %31, %32 : vector<64x128xi32>
    %34 = math.tanh %30 : vector<64x128xf32>
    %cst_20 = arith.constant 0.000000e+00 : f32
    %35 = vector.broadcast %cst_20 : f32 to vector<64x128xf32>
    %36 = arith.maximumf %30, %35 : vector<64x128xf32>
    %37 = arith.select %33, %34, %36 : vector<64x128xi1>, vector<64x128xf32>
    %c0_21 = arith.constant 0 : index
    %c0_22 = arith.constant 0 : index
    %38 = vector.load %arg8[%c0_21, %c0_22] : memref<64x64xf32, #tpu.memory_space<vmem>>, vector<64x64xf32>
    %cst_23 = arith.constant dense<0.000000e+00> : vector<64x128xf32>
    %39 = tpu.matmul %38, %37, %cst_23 {dimension_numbers = #tpu.dot_dimension_numbers<[1], [0], [0], [1], [0, 0, 1, 1], [], []>} : vector<64x64xf32>, vector<64x128xf32>, vector<64x128xf32> -> vector<64x128xf32>
    %c0_24 = arith.constant 0 : index
    %c0_25 = arith.constant 0 : index
    %40 = vector.load %arg9[%c0_24, %c0_25] : memref<64x1xf32, #tpu.memory_space<vmem>>, vector<64x1xf32>
    %41 = vector.broadcast %40 : vector<64x1xf32> to vector<64x128xf32>
    %42 = arith.addf %39, %41 : vector<64x128xf32>
    %43 = tpu.iota {dimensions = array<i32: 0>} : vector<64x128xi32>
    %c32_i32_26 = arith.constant 32 : i32
    %44 = vector.broadcast %c32_i32_26 : i32 to vector<64x128xi32>
    %45 = arith.cmpi slt, %43, %44 : vector<64x128xi32>
    %46 = math.tanh %42 : vector<64x128xf32>
    %cst_27 = arith.constant 0.000000e+00 : f32
    %47 = vector.broadcast %cst_27 : f32 to vector<64x128xf32>
    %48 = arith.maximumf %42, %47 : vector<64x128xf32>
    %49 = arith.select %45, %46, %48 : vector<64x128xi1>, vector<64x128xf32>
    %c0_28 = arith.constant 0 : index
    %c0_29 = arith.constant 0 : index
    %50 = vector.load %arg10[%c0_28, %c0_29] : memref<8x64xf32, #tpu.memory_space<vmem>>, vector<8x64xf32>
    %cst_30 = arith.constant dense<0.000000e+00> : vector<8x128xf32>
    %51 = tpu.matmul %50, %49, %cst_30 {dimension_numbers = #tpu.dot_dimension_numbers<[1], [0], [0], [1], [0, 0, 1, 1], [], []>} : vector<8x64xf32>, vector<64x128xf32>, vector<8x128xf32> -> vector<8x128xf32>
    %c0_31 = arith.constant 0 : index
    %c0_32 = arith.constant 0 : index
    %52 = vector.load %arg11[%c0_31, %c0_32] : memref<8x1xf32, #tpu.memory_space<vmem>>, vector<8x1xf32>
    %53 = vector.broadcast %52 : vector<8x1xf32> to vector<8x128xf32>
    %54 = arith.addf %51, %53 : vector<8x128xf32>
    %55 = vector.extract_strided_slice %54 {offsets = [0, 0], sizes = [4, 128], strides = [1, 1]} : vector<8x128xf32> to vector<4x128xf32>
    %56 = vector.extract_strided_slice %54 {offsets = [4, 0], sizes = [4, 128], strides = [1, 1]} : vector<8x128xf32> to vector<4x128xf32>
    %57 = arith.subf %55, %56 : vector<4x128xf32>
    %58 = vector.broadcast %24 : vector<1x128xf32> to vector<4x128xf32>
    %59 = arith.mulf %58, %57 : vector<4x128xf32>
    %60 = arith.addf %56, %59 : vector<4x128xf32>
    %c0_33 = arith.constant 0 : index
    %c0_34 = arith.constant 0 : index
    %61 = vector.load %arg12[%c0_33, %c0_34] : memref<4x128xf32, #tpu.memory_space<vmem>>, vector<4x128xf32>
    tpu.vector_store %arg12[%c0_33, %c0_34], %60 {strides = array<i32>} : memref<4x128xf32, #tpu.memory_space<vmem>>, vector<4x128xf32>,
    return
  }
  func.func @transform_0(%arg0: i32) -> (i32, i32) {
    %c0_i32 = arith.constant 0 : i32
    %c0_i32_0 = arith.constant 0 : i32
    return %c0_i32, %arg0 : i32, i32
  }
  func.func @transform_1(%arg0: i32) -> (i32, i32) {
    %c0_i32 = arith.constant 0 : i32
    %c0_i32_0 = arith.constant 0 : i32
    %c0_i32_1 = arith.constant 0 : i32
    return %c0_i32, %c0_i32_0 : i32, i32
  }
  func.func @transform_2(%arg0: i32) -> (i32, i32) {
    %c0_i32 = arith.constant 0 : i32
    %c0_i32_0 = arith.constant 0 : i32
    %c0_i32_1 = arith.constant 0 : i32
    return %c0_i32, %c0_i32_0 : i32, i32
  }
  func.func @transform_3(%arg0: i32) -> (i32, i32) {
    %c0_i32 = arith.constant 0 : i32
    %c0_i32_0 = arith.constant 0 : i32
    %c0_i32_1 = arith.constant 0 : i32
    return %c0_i32, %c0_i32_0 : i32, i32
  }
  func.func @transform_4(%arg0: i32) -> (i32, i32) {
    %c0_i32 = arith.constant 0 : i32
    %c0_i32_0 = arith.constant 0 : i32
    %c0_i32_1 = arith.constant 0 : i32
    return %c0_i32, %c0_i32_0 : i32, i32
  }
  func.func @transform_5(%arg0: i32) -> (i32, i32) {
    %c0_i32 = arith.constant 0 : i32
    %c0_i32_0 = arith.constant 0 : i32
    %c0_i32_1 = arith.constant 0 : i32
    return %c0_i32, %c0_i32_0 : i32, i32
  }
  func.func @transform_6(%arg0: i32) -> (i32, i32) {
    %c0_i32 = arith.constant 0 : i32
    %c0_i32_0 = arith.constant 0 : i32
    %c0_i32_1 = arith.constant 0 : i32
    return %c0_i32, %c0_i32_0 : i32, i32
  }
  func.func @transform_7(%arg0: i32) -> (i32, i32) {
    %c0_i32 = arith.constant 0 : i32
    %c0_i32_0 = arith.constant 0 : i32
    %c0_i32_1 = arith.constant 0 : i32
    return %c0_i32, %c0_i32_0 : i32, i32
  }
  func.func @transform_8(%arg0: i32) -> (i32, i32) {
    %c0_i32 = arith.constant 0 : i32
    %c0_i32_0 = arith.constant 0 : i32
    %c0_i32_1 = arith.constant 0 : i32
    return %c0_i32, %c0_i32_0 : i32, i32
  }
  func.func @transform_9(%arg0: i32) -> (i32, i32) {
    %c0_i32 = arith.constant 0 : i32
    %c0_i32_0 = arith.constant 0 : i32
    %c0_i32_1 = arith.constant 0 : i32
    return %c0_i32, %c0_i32_0 : i32, i32
  }
  func.func @transform_10(%arg0: i32) -> (i32, i32) {
    %c0_i32 = arith.constant 0 : i32
    %c0_i32_0 = arith.constant 0 : i32
    %c0_i32_1 = arith.constant 0 : i32
    return %c0_i32, %c0_i32_0 : i32, i32
  }
  func.func @transform_11(%arg0: i32) -> (i32, i32) {
    %c0_i32 = arith.constant 0 : i32
    %c0_i32_0 = arith.constant 0 : i32
    return %c0_i32, %arg0 : i32, i32
  }
}

</mosaic_0001>

<bundles_post_ra>
// kernel: multi_scale_neural_ode_forward.1
= control target key start
LH: loop header
LB: loop body
LE: loop exit
PB: predicated region body
PF: predicated region fallthrough
CT: control target
= control target key end

     0   :  { %vm162_vm0 = vcmask 1046528   ;;  %v714_v0 = vmov 0   ;;  %vm125_vm1 = vcmask 56320   ;;  %vm372_vm2 = vcmask 523264   ;;  %s1016_s2 = inlined_call_operand.vmem [shape: f32[96,1], index: 2, kind: input, shape index: {}]   ;;  %s1017_s0 = inlined_call_operand.vmem [shape: f32[7,128], index: 0, kind: input, shape index: {}]   ;;  %s1018_s1 = inlined_call_operand.vmem [shape: f32[96,7], index: 1, kind: input, shape index: {}]   ;;  %s1019_s6 = inlined_call_operand.vmem [shape: f32[64,1], index: 6, kind: input, shape index: {}]   ;;  %s1020_s4 = inlined_call_operand.<no memory space> [shape: f32[1,1], index: 4, kind: input, shape index: {}]   ;;  %s1021_s8 = inlined_call_operand.vmem [shape: f32[64,1], index: 8, kind: input, shape index: {}]   ;;  %s1022_s10 = inlined_call_operand.vmem [shape: f32[8,1], index: 10, kind: input, shape index: {}]   ;;  %s1023_s5 = inlined_call_operand.vmem [shape: f32[64,64], index: 5, kind: input, shape index: {}]   ;;  %s1024_s3 = inlined_call_operand.vmem [shape: f32[1,96], index: 3, kind: input, shape index: {}]   ;;  %s1025_s7 = inlined_call_operand.vmem [shape: f32[64,64], index: 7, kind: input, shape index: {}]   ;;  %s1026_s9 = inlined_call_operand.vmem [shape: f32[8,64], index: 9, kind: input, shape index: {}]   ;;  %s1027_s11 = inlined_call_operand.vmem [shape: f32[4,128], index: 11, kind: output, shape index: {}]  }
   0x1   :  { %686 = vset.pattern.permute.xlu1 %v714_v0  ;;  %685 = vset.pattern.permute.xlu0 %v714_v0  ;;  %v60_v1 = vld [vmem:[%s1016_s2 + $0x38] sm:$0xff]  ;;  %v40_v3 = vld [vmem:[%s1017_s0] sm:$0x7f]  ;;  %v55_v5 = vld [vmem:[%s1016_s2 + $0x10] sm:$0xff]  ;;  %v16_v25 = vstv %s1020_s4  ;;  %vm288_vm3 = vcmask 785408  }
   0x2   :  { %v56_v2 = vld [vmem:[%s1016_s2 + $0x18] sm:$0xff]  ;;  %102 = vperm.xlu0 %685, %v60_v1   ;;  %v41_v4 = vld [vmem:[%s1018_s1] sm:$0xff]  ;;  %652 = vmatpush.msk.msra.mxu0 %vm162_vm0, %v40_v3  ;;  %v50_v6 = vld [vmem:[%s1018_s1 + $0x48] sm:$0xff]  ;;  %17 = vst [vmem:[#allocation2] sm:$0x1] %v16_v25 }
   0x3   :  { %82 = vperm.xlu1 %686, %v56_v2   ;;  %687 = vset.pattern.permute.xlu2 %v714_v0  ;;  %v59_v7 = vld [vmem:[%s1016_s2 + $0x30] sm:$0xff]  ;;  %v58_v8 = vld [vmem:[%s1016_s2 + $0x28] sm:$0xff]  ;;  %v57_v10 = vld [vmem:[%s1016_s2 + $0x20] sm:$0xff] }
   0x4   :  { %653 = vmatmul.msk.f32.vlgmr.msra.gmra.mxu0 %vm125_vm1, %v41_v4  ;;  %683 = vmatpush.msk.msra.mxu1 %vm162_vm0, %v40_v3  ;;  %v42_v9 = vld [vmem:[%s1018_s1 + $0x8] sm:$0xff]  ;;  %v51_v11 = vld [vmem:[%s1018_s1 + $0x50] sm:$0xff]  ;;  %v53_v13 = vld [vmem:[%s1016_s2] sm:$0xff] }
   0x5   :  { %77 = vperm.xlu2 %687, %v55_v5   ;;  %662 = vmatmul.msk.f32.vlgmr.msra.gmra.mxu1 %vm125_vm1, %v50_v6  ;;  %v54_v12 = vld [vmem:[%s1016_s2 + $0x8] sm:$0xff]  ;;  %v43_v14 = vld [vmem:[%s1018_s1 + $0x10] sm:$0xff]  ;;  %v331_v15 = vld [vmem:[%s1019_s6 + $0x38] sm:$0xff] }
   0x6   :  { %v52_v16 = vld [vmem:[%s1018_s1 + $0x58] sm:$0xff]  ;;  %v330_v17 = vld [vmem:[%s1019_s6 + $0x30] sm:$0xff]  ;;  %v329_v20 = vld [vmem:[%s1019_s6 + $0x28] sm:$0xff] }
   0x7   :  { %v327_v18 = vld [vmem:[%s1019_s6 + $0x18] sm:$0xff]  ;;  %v326_v21 = vld [vmem:[%s1019_s6 + $0x10] sm:$0xff]  ;;  %v328_v22 = vld [vmem:[%s1019_s6 + $0x20] sm:$0xff] }
   0x8   :  { %v44_v19 = vld [vmem:[%s1018_s1 + $0x18] sm:$0xff]  ;;  %v45_v23 = vld [vmem:[%s1018_s1 + $0x20] sm:$0xff]  ;;  %v325_v24 = vld [vmem:[%s1019_s6 + $0x8] sm:$0xff] }
   0x9   :  { %v324_v26 = vld [vmem:[%s1019_s6] sm:$0xff]  ;;  %v64_v27 = vld [vmem:[%s1016_s2 + $0x58] sm:$0xff]  ;;  %v46_v28 = vld [vmem:[%s1018_s1 + $0x28] sm:$0xff] }
   0xa   :  { %97 = vperm.xlu0 %685, %v59_v7   ;;  %v63_v29 = vld [vmem:[%s1016_s2 + $0x50] sm:$0xff]  ;;  %v62_v30 = vld [vmem:[%s1016_s2 + $0x48] sm:$0xff]  ;;  %v61_v31 = vld [vmem:[%s1016_s2 + $0x40] sm:$0xff] }
   0xb   :  { %92 = vperm.xlu1 %686, %v58_v8   ;;  %v47_v32 = vld [vmem:[%s1018_s1 + $0x30] sm:$0xff]  ;;  %v477_v33 = vld [vmem:[%s1021_s8 + $0x38] sm:$0xff]  ;;  %v475_v37 = vld [vmem:[%s1021_s8 + $0x28] sm:$0xff] }
   0xc   :  { %654 = vmatmul.msk.f32.gmra.mxu0 %vm125_vm1, %v42_v9  ;;  %v476_v34 = vld [vmem:[%s1021_s8 + $0x30] sm:$0xff]  ;;  %v473_v35 = vld [vmem:[%s1021_s8 + $0x18] sm:$0xff]  ;;  %v474_v39 = vld [vmem:[%s1021_s8 + $0x20] sm:$0xff] }
   0xd   :  { %87 = vperm.xlu2 %687, %v57_v10   ;;  %663 = vmatmul.msk.f32.gmra.mxu1 %vm125_vm1, %v51_v11  ;;  %v48_v36 = vld [vmem:[%s1018_s1 + $0x38] sm:$0xff]  ;;  %v472_v38 = vld [vmem:[%s1021_s8 + $0x10] sm:$0xff]  ;;  %v49_v40 = vld [vmem:[%s1018_s1 + $0x40] sm:$0xff] }
   0xe   :  { %v471_v41 = vld [vmem:[%s1021_s8 + $0x8] sm:$0xff]  ;;  %v470_v42 = vld [vmem:[%s1021_s8] sm:$0xff] }
   0xf   :  { %v281_v43 = vld [vmem:[#allocation2] sm:$0x1] }
  0x10   :  { %v608_v44 = vld [vmem:[%s1022_s10] sm:$0xff] }
  0x12   :  { %72 = vperm.xlu0 %685, %v54_v12  }
  0x13   :  { %67 = vperm.xlu1 %686, %v53_v13  }
  0x14   :  { %655 = vmatmul.msk.f32.gmra.mxu0 %vm125_vm1, %v43_v14 }
  0x15   :  { %369 = vperm.xlu2 %687, %v331_v15   ;;  %664 = vmatmul.msk.f32.gmra.mxu1 %vm125_vm1, %v52_v16 }
  0x1a   :  { %364 = vperm.xlu0 %685, %v330_v17  }
  0x1b   :  { %349 = vperm.xlu1 %686, %v327_v18  }
  0x1c   :  { %656 = vmatmul.msk.f32.gmra.mxu0 %vm125_vm1, %v44_v19 }
  0x1d   :  { %359 = vperm.xlu2 %687, %v329_v20  }
  0x22   :  { %344 = vperm.xlu0 %685, %v326_v21  }
  0x23   :  { %354 = vperm.xlu1 %686, %v328_v22  }
  0x24   :  { %657 = vmatmul.msk.f32.gmra.mxu0 %vm125_vm1, %v45_v23 }
  0x25   :  { %339 = vperm.xlu2 %687, %v325_v24  }
  0x2a   :  { %334 = vperm.xlu0 %685, %v324_v26  }
  0x2b   :  { %122 = vperm.xlu1 %686, %v64_v27  }
  0x2c   :  { %658 = vmatmul.msk.f32.gmra.mxu0 %vm125_vm1, %v46_v28 }
  0x2d   :  { %117 = vperm.xlu2 %687, %v63_v29  }
  0x32   :  { %112 = vperm.xlu0 %685, %v62_v30  }
  0x33   :  { %107 = vperm.xlu1 %686, %v61_v31  }
  0x34   :  { %659 = vmatmul.msk.f32.gmra.mxu0 %vm125_vm1, %v47_v32 }
  0x35   :  { %515 = vperm.xlu2 %687, %v477_v33  }
  0x3a   :  { %510 = vperm.xlu0 %685, %v476_v34  }
  0x3b   :  { %495 = vperm.xlu1 %686, %v473_v35  }
  0x3c   :  { %660 = vmatmul.msk.f32.gmra.mxu0 %vm125_vm1, %v48_v36  ;;  %v316_v36 = vld [vmem:[%s1023_s5] sm:$0xff] }
  0x3d   :  { %505 = vperm.xlu2 %687, %v475_v37  }
  0x42   :  { %490 = vperm.xlu0 %685, %v472_v38   ;;  %v317_v38 = vld [vmem:[%s1023_s5 + $0x8] sm:$0xff] }
  0x43   :  { %500 = vperm.xlu1 %686, %v474_v39   ;;  %v280_v39 = vld [vmem:[%s1024_s3] sm:$0x1] }
  0x44   :  { %661 = vmatmul.msk.f32.gmra.mxu0 %vm125_vm1, %v49_v40  ;;  %v318_v40 = vld [vmem:[%s1023_s5 + $0x10] sm:$0xff] }
  0x45   :  { %485 = vperm.xlu2 %687, %v471_v41   ;;  %v319_v41 = vld [vmem:[%s1023_s5 + $0x18] sm:$0xff] }
  0x4a   :  { %480 = vperm.xlu0 %685, %v470_v42   ;;  %v320_v42 = vld [vmem:[%s1023_s5 + $0x20] sm:$0xff] }
  0x4b   :  { %284 = vperm.xlu1 %686, %v281_v43   ;;  %v321_v43 = vld [vmem:[%s1023_s5 + $0x28] sm:$0xff] }
  0x4d   :  { %611 = vperm.xlu2 %687, %v608_v44   ;;  %v322_v44 = vld [vmem:[%s1023_s5 + $0x30] sm:$0xff] }
  0x5f   :  { %v78_v45 = vpop.permute.xlu2 %77 }
  0x67   :  { %v88_v46 = vpop.permute.xlu2 %87 }
  0x6f   :  { %v918_v49 = vpop.permute.xlu2 %369 }
  0x74   :  { %v103_v47 = vpop.permute.xlu0 %102 }
  0x75   :  { %v83_v48 = vpop.permute.xlu1 %82 }
  0x77   :  { %v920_v55 = vpop.permute.xlu2 %359 }
  0x7c   :  { %v98_v50 = vpop.permute.xlu0 %97 }
  0x7d   :  { %v93_v51 = vpop.permute.xlu1 %92 }
  0x7f   :  { %v926_v60 = vpop.permute.xlu2 %339 }
  0x81   :  { %v183_v52 = vpop.f32.mrf.mxu0 }
  0x82   :  { %v210_v56 = vpop.f32.mrf.mxu1 }
  0x84   :  { %v73_v53 = vpop.permute.xlu0 %72 }
  0x85   :  { %v68_v54 = vpop.permute.xlu1 %67 }
  0x86   :  { %v184_v27 = vadd.f32 %v183_v52, %v68_v54 }
  0x87   :  { %v118_v2 = vpop.permute.xlu2 %117 }
  0x89   :  { %v186_v57 = vpop.f32.mrf.mxu0 }
  0x8a   :  { %v213_v61 = vpop.f32.mrf.mxu1  ;;  %v187_v25 = vadd.f32 %v186_v57, %v73_v53 }
  0x8b   :  { %v214_v4 = vadd.f32 %v213_v61, %v118_v2 }
  0x8c   :  { %v922_v58 = vpop.permute.xlu0 %364 }
  0x8d   :  { %v924_v59 = vpop.permute.xlu1 %349  ;;  %v266_v8 = vmax.f32 %v214_v4, 0.0 }
  0x91   :  { %v189_v62 = vpop.f32.mrf.mxu0 }
  0x92   :  { %v216_v3 = vpop.f32.mrf.mxu1  ;;  %v190_v22 = vadd.f32 %v189_v62, %v78_v45  ;;  %v323_v45 = vld [vmem:[%s1023_s5 + $0x38] sm:$0xff] }
  0x94   :  { %v928_v63 = vpop.permute.xlu0 %344 }
  0x95   :  { %v930_v0 = vpop.permute.xlu1 %354 }
  0x99   :  { %v192_v1 = vpop.f32.mrf.mxu0 }
  0x9a   :  { %v193_v19 = vadd.f32 %v192_v1, %v83_v48 }
  0x9c   :  { %v932_v5 = vpop.permute.xlu0 %334  ;;  %688 = vtanh.f32 %v193_v19 }
  0x9d   :  { %v123_v6 = vpop.permute.xlu1 %122  ;;  %690 = vtanh.f32 %v190_v22 }
  0x9e   :  { %v217_v7 = vadd.f32 %v216_v3, %v123_v6  ;;  %692 = vtanh.f32 %v187_v25 }
  0x9f   :  { %694 = vtanh.f32 %v184_v27 }
  0xa0   :  { %v267_v9 = vmax.f32 %v217_v7, 0.0 }
  0xa1   :  { %v195_v10 = vpop.f32.mrf.mxu0 }
  0xa2   :  { %296 = vmatpush.msrb.mxu1 %v267_v9  ;;  %v196_v23 = vadd.f32 %v195_v10, %v88_v46  ;;  %v689_v33 = vpop.eup %688  ;;  %v465_v9 = vld [vmem:[%s1025_s7 + $0x18] sm:$0xff]  ;;  %v466_v10 = vld [vmem:[%s1025_s7 + $0x20] sm:$0xff] }
  0xa3   :  { %v691_v34 = vpop.eup %690 }
  0xa4   :  { %297 = vmatpush.msrb.mxu1 %v266_v8  ;;  %v113_v11 = vpop.permute.xlu0 %112  ;;  %v260_v30 = vmax.f32 %v196_v23, 0.0  ;;  %v693_v35 = vpop.eup %692  ;;  %v464_v8 = vld [vmem:[%s1025_s7 + $0x10] sm:$0xff] }
  0xa5   :  { %v211_v12 = vadd.f32 %v210_v56, %v113_v11  ;;  %v108_v28 = vpop.permute.xlu1 %107  ;;  %v695_v37 = vpop.eup %694  ;;  %v467_v11 = vld [vmem:[%s1025_s7 + $0x28] sm:$0xff] }
  0xa7   :  { %v265_v13 = vmax.f32 %v211_v12, 0.0  ;;  %v468_v12 = vld [vmem:[%s1025_s7 + $0x30] sm:$0xff] }
  0xa9   :  { %v198_v14 = vpop.f32.mrf.mxu0  ;;  %298 = vmatpush.msrb.mxu1 %v265_v13  ;;  %v469_v13 = vld [vmem:[%s1025_s7 + $0x38] sm:$0xff] }
  0xaa   :  { %v199_v20 = vadd.f32 %v198_v14, %v93_v51 }
  0xac   :  { %v261_v26 = vmax.f32 %v199_v20, 0.0  ;;  %v516_v20 = vpop.permute.xlu2 %515 }
  0xad   :  { %v496_v23 = vpop.permute.xlu1 %495 }
  0xb1   :  { %v201_v15 = vpop.f32.mrf.mxu0 }
  0xb2   :  { %v202_v17 = vadd.f32 %v201_v15, %v98_v50 }
  0xb4   :  { %v262_v24 = vmax.f32 %v202_v17, 0.0 }
  0xb9   :  { %v204_v16 = vpop.f32.mrf.mxu0 }
  0xba   :  { %v205_v18 = vadd.f32 %v204_v16, %v103_v47 }
  0xbc   :  { %v263_v21 = vmax.f32 %v205_v18, 0.0 }
  0xbe   :  { %405 = vmatpush.msra.mxu2 %v263_v21 }
  0xc0   :  { %406 = vmatpush.msra.mxu2 %v262_v24 }
  0xc1   :  { %v207_v29 = vpop.f32.mrf.mxu0 }
  0xc2   :  { %v208_v31 = vadd.f32 %v207_v29, %v108_v28  ;;  %407 = vmatpush.msra.mxu2 %v261_v26 }
  0xc4   :  { %v264_v32 = vmax.f32 %v208_v31, 0.0  ;;  %408 = vmatpush.msra.mxu2 %v260_v30 }
  0xc6   :  { %299 = vmatpush.msrb.mxu1 %v264_v32  ;;  %409 = vmatpush.msra.mxu2 %v689_v33  ;;  %v501_v32 = vpop.permute.xlu1 %500 }
  0xc8   :  { %300 = vmatpush.msrb.mxu1 %v263_v21  ;;  %410 = vmatpush.msra.mxu2 %v691_v34  ;;  %v511_v21 = vpop.permute.xlu0 %510 }
  0xca   :  { %301 = vmatpush.msrb.mxu1 %v262_v24  ;;  %411 = vmatpush.msra.mxu2 %v693_v35  ;;  %v506_v24 = vpop.permute.xlu2 %505 }
  0xcc   :  { %302 = vmatpush.msrb.mxu1 %v261_v26  ;;  %412 = vmatpush.msra.mxu2 %v695_v37 }
  0xcd   :  { %666 = vmatmul.msk.f32.vlgmr.msra.gmra.mxu2 %vm372_vm2, %v316_v36 }
  0xce   :  { %303 = vmatpush.msrb.mxu1 %v260_v30 }
  0xd0   :  { %304 = vmatpush.msrb.mxu1 %v689_v33  ;;  %v491_v25 = vpop.permute.xlu0 %490 }
  0xd2   :  { %305 = vmatpush.msrb.mxu1 %v691_v34  ;;  %v486_v34 = vpop.permute.xlu2 %485 }
  0xd4   :  { %306 = vmatpush.msrb.mxu1 %v693_v35 }
  0xd5   :  { %667 = vmatmul.msk.f32.gmra.mxu2 %vm372_vm2, %v317_v38 }
  0xd6   :  { %307 = vmatpush.msrb.mxu1 %v695_v37 }
  0xd7   :  { %665 = vmatmul.msk.f32.vlgmr.msrb.gmra.mxu1 %vm288_vm3, %v280_v39 }
  0xd8   :  { %v481_v38 = vpop.permute.xlu0 %480 }
  0xdd   :  { %668 = vmatmul.msk.f32.gmra.mxu2 %vm372_vm2, %v318_v40 }
  0xe5   :  { %669 = vmatmul.msk.f32.gmra.mxu2 %vm372_vm2, %v319_v41 }
  0xed   :  { %670 = vmatmul.msk.f32.gmra.mxu2 %vm372_vm2, %v320_v42 }
  0xf5   :  { %671 = vmatmul.msk.f32.gmra.mxu2 %vm372_vm2, %v321_v43 }
  0xfd   :  { %672 = vmatmul.msk.f32.gmra.mxu2 %vm372_vm2, %v322_v44 }
 0x105   :  { %673 = vmatmul.msk.f32.gmra.mxu2 %vm372_vm2, %v323_v45  ;;  %v607_v45 = vld [vmem:[%s1026_s9] sm:$0xff] }
 0x150   :  { %v414_v46 = vpop.f32.mrf.mxu2 }
 0x158   :  { %v417_v47 = vpop.f32.mrf.mxu2 }
 0x159   :  { %v418_v6 = vadd.f32 %v417_v47, %v926_v60  ;;  %v462_v60 = vld [vmem:[%s1025_s7] sm:$0xff]  ;;  %v285_v47 = vpop.permute.xlu1 %284 }
 0x160   :  { %v420_v48 = vpop.f32.mrf.mxu2 }
 0x161   :  { %v421_v2 = vadd.f32 %v420_v48, %v928_v63  ;;  %v309_v48 = vpop.f32.mrf.mxu1 }
 0x168   :  { %v423_v50 = vpop.f32.mrf.mxu2 }
 0x169   :  { %v424_v61 = vadd.f32 %v423_v50, %v924_v59  ;;  %v287_v50 = vperm.slane %v285_v47, 0 }
 0x16b   :  { %696 = vtanh.f32 %v424_v61 }
 0x16c   :  { %698 = vtanh.f32 %v421_v2 }
 0x16d   :  { %700 = vtanh.f32 %v418_v6 }
 0x170   :  { %v426_v51 = vpop.f32.mrf.mxu2 }
 0x171   :  { %v427_v3 = vadd.f32 %v426_v51, %v930_v0  ;;  %v310_v51 = vadd.f32 %v309_v48, %v287_v50 }
 0x178   :  { %v429_v52 = vpop.f32.mrf.mxu2 }
 0x179   :  { %v430_v62 = vadd.f32 %v429_v52, %v920_v55  ;;  %v697_v55 = vpop.eup %696  ;;  %v312_v52 = vmul.f32 0.5, %v310_v51 }
 0x17a   :  { %v699_v59 = vpop.eup %698 }
 0x17b   :  { %v451_v7 = vmax.f32 %v430_v62, 0.0  ;;  %v701_v63 = vpop.eup %700 }
 0x180   :  { %v432_v53 = vpop.f32.mrf.mxu2 }
 0x181   :  { %v433_v56 = vadd.f32 %v432_v53, %v922_v58  ;;  %v415_v58 = vadd.f32 %v414_v46, %v932_v5  ;;  %v463_v5 = vld [vmem:[%s1025_s7 + $0x8] sm:$0xff] }
 0x183   :  { %v452_v4 = vmax.f32 %v433_v56, 0.0  ;;  %702 = vtanh.f32 %v415_v58  ;;  %v612_v56 = vpop.permute.xlu2 %611 }
 0x188   :  { %v435_v54 = vpop.f32.mrf.mxu2 }
 0x189   :  { %v436_v57 = vadd.f32 %v435_v54, %v918_v49  ;;  %v450_v49 = vmax.f32 %v427_v3, 0.0  ;;  %v703_v0 = vpop.eup %702 }
 0x18b   :  { %v453_v1 = vmax.f32 %v436_v57, 0.0 }
 0x18d   :  { %550 = vmatpush.msra.mxu3 %v453_v1 }
 0x18f   :  { %551 = vmatpush.msra.mxu3 %v452_v4 }
 0x191   :  { %552 = vmatpush.msra.mxu3 %v451_v7 }
 0x193   :  { %553 = vmatpush.msra.mxu3 %v450_v49 }
 0x195   :  { %554 = vmatpush.msra.mxu3 %v697_v55 }
 0x197   :  { %555 = vmatpush.msra.mxu3 %v699_v59 }
 0x199   :  { %556 = vmatpush.msra.mxu3 %v701_v63 }
 0x19b   :  { %557 = vmatpush.msra.mxu3 %v703_v0 }
 0x19c   :  { %674 = vmatmul.msk.f32.vlgmr.msra.gmra.mxu3 %vm372_vm2, %v462_v60 }
 0x1a4   :  { %675 = vmatmul.msk.f32.gmra.mxu3 %vm372_vm2, %v463_v5 }
 0x1ac   :  { %676 = vmatmul.msk.f32.gmra.mxu3 %vm372_vm2, %v464_v8 }
 0x1b4   :  { %677 = vmatmul.msk.f32.gmra.mxu3 %vm372_vm2, %v465_v9 }
 0x1bc   :  { %678 = vmatmul.msk.f32.gmra.mxu3 %vm372_vm2, %v466_v10 }
 0x1c4   :  { %679 = vmatmul.msk.f32.gmra.mxu3 %vm372_vm2, %v467_v11 }
 0x1cc   :  { %680 = vmatmul.msk.f32.gmra.mxu3 %vm372_vm2, %v468_v12 }
 0x1d4   :  { %681 = vmatmul.msk.f32.gmra.mxu3 %vm372_vm2, %v469_v13 }
 0x21f   :  { %v559_v14 = vpop.f32.mrf.mxu3 }
 0x220   :  { %v560_v40 = vadd.f32 %v559_v14, %v481_v38 }
 0x227   :  { %v562_v15 = vpop.f32.mrf.mxu3 }
 0x228   :  { %v563_v37 = vadd.f32 %v562_v15, %v486_v34 }
 0x22f   :  { %v565_v16 = vpop.f32.mrf.mxu3 }
 0x230   :  { %v566_v33 = vadd.f32 %v565_v16, %v491_v25 }
 0x237   :  { %v568_v17 = vpop.f32.mrf.mxu3 }
 0x238   :  { %v569_v29 = vadd.f32 %v568_v17, %v496_v23 }
 0x23a   :  { %704 = vtanh.f32 %v569_v29 }
 0x23b   :  { %706 = vtanh.f32 %v566_v33 }
 0x23c   :  { %708 = vtanh.f32 %v563_v37 }
 0x23d   :  { %710 = vtanh.f32 %v560_v40 }
 0x23e   :  { %712 = vtanh.f32 %v312_v52 }
 0x23f   :  { %v571_v18 = vpop.f32.mrf.mxu3 }
 0x240   :  { %v572_v35 = vadd.f32 %v571_v18, %v501_v32  ;;  %v705_v42 = vpop.eup %704 }
 0x241   :  { %v707_v43 = vpop.eup %706 }
 0x242   :  { %v595_v41 = vmax.f32 %v572_v35, 0.0  ;;  %v709_v44 = vpop.eup %708 }
 0x243   :  { %v711_v46 = vpop.eup %710 }
 0x244   :  { %v713_v53 = vpop.eup %712 }
 0x245   :  { %v314_v54 = vmul.f32 0.5, %v713_v53 }
 0x247   :  { %v574_v19 = vpop.f32.mrf.mxu3  ;;  %v315_v61 = vadd.f32 0.5, %v314_v54 }
 0x248   :  { %v575_v30 = vadd.f32 %v574_v19, %v506_v24 }
 0x249   :  { %v641_v2 = vperm.slane %v315_v61, 0 }
 0x24a   :  { %v596_v39 = vmax.f32 %v575_v30, 0.0 }
 0x24f   :  { %v577_v22 = vpop.f32.mrf.mxu3 }
 0x250   :  { %v578_v27 = vadd.f32 %v577_v22, %v511_v21 }
 0x252   :  { %v597_v36 = vmax.f32 %v578_v27, 0.0 }
 0x257   :  { %v580_v26 = vpop.f32.mrf.mxu3 }
 0x258   :  { %v581_v28 = vadd.f32 %v580_v26, %v516_v20 }
 0x25a   :  { %v598_v31 = vmax.f32 %v581_v28, 0.0 }
 0x25c   :  { %625 = vmatpush.msra.mxu1 %v598_v31 }
 0x25e   :  { %626 = vmatpush.msra.mxu1 %v597_v36 }
 0x260   :  { %627 = vmatpush.msra.mxu1 %v596_v39 }
 0x262   :  { %628 = vmatpush.msra.mxu1 %v595_v41 }
 0x264   :  { %629 = vmatpush.msra.mxu1 %v705_v42 }
 0x266   :  { %630 = vmatpush.msra.mxu1 %v707_v43 }
 0x268   :  { %631 = vmatpush.msra.mxu1 %v709_v44 }
 0x26a   :  { %632 = vmatpush.msra.mxu1 %v711_v46 }
 0x26b   :  { %682 = vmatmul.msk.f32.vlgmr.msra.gmra.mxu1 %vm372_vm2, %v607_v45 }
 0x2e8   :  { %v634_v57 = vpop.f32.mrf.mxu1 }
 0x2e9   :  { %v635_v62 = vadd.f32 %v634_v57, %v612_v56 }
 0x2eb   :  { %v638_v1 = vrot.slane %v635_v62, 4 }
 0x2ed   :  { %v640_v3 = vsub.f32 %v635_v62, %v638_v1 }
 0x2ef   :  { %v642_v4 = vmul.f32 %v641_v2, %v640_v3 }
 0x2f1   :  { %v644_v6 = vrot.slane %v642_v4, 4 }
 0x2f3   :  { %v646_v7 = vadd.f32 %v644_v6, %v635_v62 }
 0x2f5   :  { %647 = vst [vmem:[%s1027_s11 - $0x4] sm:$0xf0] %v646_v7 }

</bundles_post_ra>
